<compile_context>
chip_gen: v5e
topology: v5e:2x2
jax: 0.10.0
libtpu: 0.0.40
codegen_flags: <defaults>
</compile_context>

<pallas_src>
import math

import numpy as np
import jax
import jax.numpy as jnp
from jax.experimental import pallas as pl
from jax.experimental.pallas import tpu as pltpu

EPS = 1e-12


def _hann_weights(kernel_size: int) -> np.ndarray:
    # torch.hann_window(kernel_size + 2, periodic=False)[1:-1], normalized so each 1D
    # factor sums to 1 (=> 2D outer-product kernel sums to 1).
    n = kernel_size + 2
    idx = np.arange(n, dtype=np.float64)
    w = 0.5 * (1.0 - np.cos(2.0 * math.pi * idx / (n - 1)))
    w = w[1:-1]
    return (w / w.sum()).astype(np.float32)


def _conv_matrix(out_len: int, in_len: int, stride: int, padding: int,
                 taps: np.ndarray) -> np.ndarray:
    # m[i, i*stride - padding + t] = taps[t]  (entries falling outside [0, in_len) are
    # dropped, which is exactly zero-padding). Built with numpy -> no trace-time blowup.
    m = np.zeros((out_len, in_len), np.float32)
    rows = np.arange(out_len)
    for t, wt in enumerate(taps):
        cols = rows * stride - padding + t
        ok = (cols >= 0) & (cols < in_len)
        m[rows[ok], cols[ok]] = wt
    return m


def _pick_channel_block(C: int, H: int, W: int, itemsize: int) -> int:
    # Largest divisor of C whose input block stays under ~2 MiB. With double-buffered
    # input + f32 intermediates this keeps total scoped VMEM well under 32 MiB, which is
    # safe on v5e/v6e and on v7x's smaller (64 MiB physical) VMEM.
    budget = 2 * 1024 * 1024
    cb = 1
    for d in range(1, C + 1):
        if C % d == 0 and d * H * W * itemsize <= budget:
            cb = d
    return cb


def _l2pool_kernel(x_ref, colm_ref, rowm_ref, o_ref):
    # x_ref:    (Cb, H, W)   unpadded input slab (native dtype)
    # colm_ref: (W, Wo)      column-direction Hann conv (stride + zero-pad folded in)
    # rowm_ref: (Ho, H)      row-direction Hann conv (stride + zero-pad folded in)
    # o_ref:    (Cb, Ho, Wo)
    Cb, H, W = x_ref.shape
    Ho = rowm_ref.shape[0]
    Wo = colm_ref.shape[1]

    xf = x_ref[...].astype(jnp.float32)   # per-vreg upcast; DMA/VMEM stay in input dtype
    xsq = xf * xf

    # Column (W) conv: one big matmul, channels folded into the MXU free dimension.
    u = jnp.dot(xsq.reshape(Cb * H, W), colm_ref[...],
                preferred_element_type=jnp.float32)          # (Cb*H, Wo)
    u = u.reshape(Cb, H, Wo)

    # Row (H) conv: channel-batched matmul (Cb, Ho, H) @ (Cb, H, Wo) -> (Cb, Ho, Wo).
    rowm_b = jnp.broadcast_to(rowm_ref[...], (Cb, Ho, H))
    out = jax.lax.dot_general(
        rowm_b, u,
        dimension_numbers=(((2,), (1,)), ((0,), (0,))),
        preferred_element_type=jnp.float32)                  # (Cb, Ho, Wo)

    o_ref[...] = jnp.sqrt(out + EPS).astype(o_ref.dtype)


def l2pool2d(x: jnp.ndarray, kernel_size: int = 3, stride: int = 2,
             padding: int = 1) -> jnp.ndarray:
    N, C, H, W = x.shape
    Ho = (H + 2 * padding - kernel_size) // stride + 1
    Wo = (W + 2 * padding - kernel_size) // stride + 1

    taps = _hann_weights(kernel_size)
    rowm = jnp.asarray(_conv_matrix(Ho, H, stride, padding, taps))      # (Ho, H)
    colm = jnp.asarray(_conv_matrix(Wo, W, stride, padding, taps).T)    # (W, Wo)

    cb = _pick_channel_block(C, H, W, x.dtype.itemsize)
    grid = (N, C // cb)

    return pl.pallas_call(
        _l2pool_kernel,
        out_shape=jax.ShapeDtypeStruct((N, C, Ho, Wo), x.dtype),
        grid_spec=pltpu.PrefetchScalarGridSpec(
            num_scalar_prefetch=0,
            grid=grid,
            in_specs=[
                # Channel-blocked input slab; leading batch dim squeezed away.
                pl.BlockSpec((pl.Squeezed(), cb, H, W), lambda n, g: (n, g, 0, 0)),
                # Weight matrices: constant index_map -> resident, loaded once.
                pl.BlockSpec((W, Wo), lambda n, g: (0, 0)),
                pl.BlockSpec((Ho, H), lambda n, g: (0, 0)),
            ],
            out_specs=pl.BlockSpec((pl.Squeezed(), cb, Ho, Wo),
                                   lambda n, g: (n, g, 0, 0)),
        ),
        compiler_params=pltpu.CompilerParams(
            dimension_semantics=("parallel", "parallel"),
            vmem_limit_bytes=32 * 1024 * 1024),
    )(x, colm, rowm)


def _reference(x, kernel_size=3, stride=2, padding=1):
    # Pure-JAX reference matching torch.nn.functional.conv2d(x**2, hann, groups=C).
    C = x.shape[1]
    w = jnp.asarray(_hann_weights(kernel_size))
    k2d = jnp.outer(w, w)  # normalized 3x3 Hann kernel
    kern = jnp.broadcast_to(k2d, (C, 1, kernel_size, kernel_size)).astype(x.dtype)
    out = jax.lax.conv_general_dilated(
        x * x, kern,
        window_strides=(stride, stride),
        padding=((padding, padding), (padding, padding)),
        dimension_numbers=("NCHW", "OIHW", "NCHW"),
        feature_group_count=C)
    return jnp.sqrt(out + EPS)


if __name__ == "__main__":
    key = jax.random.PRNGKey(0)
    x = jax.random.normal(key, (2, 4, 16, 16), dtype=jnp.float32)

    out = l2pool2d(x)
    out = jax.block_until_ready(out)

    ref = _reference(x)
    assert out.shape == (2, 4, 8, 8), out.shape
    assert jnp.allclose(out, ref, rtol=1e-5, atol=1e-5), float(jnp.max(jnp.abs(out - ref)))
    print("KERNEL_OK")
</pallas_src>

<mosaic_0001>
module attributes {stable_mosaic.version = 11 : i64} {
  func.func @_l2pool_kernel(%arg0: i32, %arg1: i32, %arg2: memref<1x4x16x16xf32, #tpu.memory_space<vmem>>, %arg3: memref<16x8xf32, #tpu.memory_space<vmem>>, %arg4: memref<8x16xf32, #tpu.memory_space<vmem>>, %arg5: memref<1x4x8x8xf32, #tpu.memory_space<vmem>>) attributes {dimension_semantics = [#tpu.dimension_semantics<parallel>, #tpu.dimension_semantics<parallel>], iteration_bounds = array<i64: 2, 1>, scalar_prefetch = 0 : i64, scratch_operands = 0 : i64, tpu.core_type = #tpu.core_type<tc>, window_params = [{transform_indices = @transform_0, window_bounds = array<i64: 1, 4, 16, 16>}, {pipeline_mode = #tpu.pipeline_mode<synchronous>, transform_indices = @transform_1, window_bounds = array<i64: 16, 8>}, {pipeline_mode = #tpu.pipeline_mode<synchronous>, transform_indices = @transform_2, window_bounds = array<i64: 8, 16>}, {transform_indices = @transform_3, window_bounds = array<i64: 1, 4, 8, 8>}]} {
    %c0 = arith.constant 0 : index
    %c0_0 = arith.constant 0 : index
    %c0_1 = arith.constant 0 : index
    %c0_2 = arith.constant 0 : index
    %0 = vector.load %arg2[%c0, %c0_0, %c0_1, %c0_2] : memref<1x4x16x16xf32, #tpu.memory_space<vmem>>, vector<1x4x16x16xf32>
    %1 = vector.shape_cast %0 : vector<1x4x16x16xf32> to vector<4x16x16xf32>
    %2 = arith.mulf %1, %1 : vector<4x16x16xf32>
    %3 = vector.shape_cast %2 : vector<4x16x16xf32> to vector<64x16xf32>
    %c0_3 = arith.constant 0 : index
    %c0_4 = arith.constant 0 : index
    %4 = vector.load %arg3[%c0_3, %c0_4] : memref<16x8xf32, #tpu.memory_space<vmem>>, vector<16x8xf32>
    %cst = arith.constant dense<0.000000e+00> : vector<64x8xf32>
    %5 = tpu.matmul %3, %4, %cst {dimension_numbers = #tpu.dot_dimension_numbers<[1], [0], [0], [1], [0, 0, 1, 1], [], []>} : vector<64x16xf32>, vector<16x8xf32>, vector<64x8xf32> -> vector<64x8xf32>
    %6 = vector.shape_cast %5 : vector<64x8xf32> to vector<4x16x8xf32>
    %c0_5 = arith.constant 0 : index
    %c0_6 = arith.constant 0 : index
    %7 = vector.load %arg4[%c0_5, %c0_6] : memref<8x16xf32, #tpu.memory_space<vmem>>, vector<8x16xf32>
    %8 = vector.shape_cast %7 : vector<8x16xf32> to vector<1x8x16xf32>
    %9 = vector.broadcast %8 : vector<1x8x16xf32> to vector<4x8x16xf32>
    %cst_7 = arith.constant dense<0.000000e+00> : vector<4x8x8xf32>
    %10 = tpu.matmul %9, %6, %cst_7 {dimension_numbers = #tpu.dot_dimension_numbers<[2], [1], [1], [2], [0, 0, 0, 1, 1, 2], [0], [0]>} : vector<4x8x16xf32>, vector<4x16x8xf32>, vector<4x8x8xf32> -> vector<4x8x8xf32>
    %cst_8 = arith.constant 9.99999996E-13 : f32
    %11 = vector.broadcast %cst_8 : f32 to vector<4x8x8xf32>
    %12 = arith.addf %10, %11 : vector<4x8x8xf32>
    %13 = math.sqrt %12 : vector<4x8x8xf32>
    %c0_9 = arith.constant 0 : index
    %c0_10 = arith.constant 0 : index
    %c0_11 = arith.constant 0 : index
    %c0_12 = arith.constant 0 : index
    %14 = vector.load %arg5[%c0_9, %c0_10, %c0_11, %c0_12] : memref<1x4x8x8xf32, #tpu.memory_space<vmem>>, vector<1x4x8x8xf32>
    %15 = vector.shape_cast %14 : vector<1x4x8x8xf32> to vector<4x8x8xf32>
    %16 = vector.shape_cast %13 : vector<4x8x8xf32> to vector<1x4x8x8xf32>
    tpu.vector_store %arg5[%c0_9, %c0_10, %c0_11, %c0_12], %16 {strides = array<i32>} : memref<1x4x8x8xf32, #tpu.memory_space<vmem>>, vector<1x4x8x8xf32>,
    return
  }
  func.func @transform_0(%arg0: i32, %arg1: i32) -> (i32, i32, i32, i32) {
    %c0_i32 = arith.constant 0 : i32
    %c0_i32_0 = arith.constant 0 : i32
    %c0_i32_1 = arith.constant 0 : i32
    return %arg0, %arg1, %c0_i32, %c0_i32_0 : i32, i32, i32, i32
  }
  func.func @transform_1(%arg0: i32, %arg1: i32) -> (i32, i32) {
    %c0_i32 = arith.constant 0 : i32
    %c0_i32_0 = arith.constant 0 : i32
    %c0_i32_1 = arith.constant 0 : i32
    return %c0_i32, %c0_i32_0 : i32, i32
  }
  func.func @transform_2(%arg0: i32, %arg1: i32) -> (i32, i32) {
    %c0_i32 = arith.constant 0 : i32
    %c0_i32_0 = arith.constant 0 : i32
    %c0_i32_1 = arith.constant 0 : i32
    return %c0_i32, %c0_i32_0 : i32, i32
  }
  func.func @transform_3(%arg0: i32, %arg1: i32) -> (i32, i32, i32, i32) {
    %c0_i32 = arith.constant 0 : i32
    %c0_i32_0 = arith.constant 0 : i32
    %c0_i32_1 = arith.constant 0 : i32
    return %arg0, %arg1, %c0_i32, %c0_i32_0 : i32, i32, i32, i32
  }
}

</mosaic_0001>

<bundles_post_ra>
// kernel: tpu_custom_call.1
= control target key start
LH: loop header
LB: loop body
LE: loop exit
PB: predicated region body
PF: predicated region fallthrough
CT: control target
= control target key end

     0   :  { %8 = vsyncpa [#allocation3], 0  ;;  %s948_s0 = inlined_call_operand.hbm [shape: f32[2,4,16,16], index: 0, kind: input, shape index: {}]   ;;  %s949_s1 = inlined_call_operand.vmem [shape: f32[16,8], index: 1, kind: input, shape index: {}]   ;;  %s950_s2 = inlined_call_operand.vmem [shape: f32[8,16], index: 2, kind: input, shape index: {}]   ;;  %s951_s3 = inlined_call_operand.hbm [shape: f32[2,4,8,8], index: 3, kind: output, shape index: {}]  }
   0x1   :  { %10 = vsyncpa [#allocation3 + $0x1], 0 }
   0x2   :  { %11 = vsyncpa [#allocation4], 0 }
   0x3   :  { %13 = vsyncpa [#allocation4 + $0x1], 0  ;;  %s785_s12 = smov 0   ;;  %s787_s13 = smov 0  }
   0x4   :  { %s789_s14 = smov 0   ;;  %s791_s15 = smov 0  }
   0x5   :  { %s793_s16 = smov 0   ;;  %s795_s17 = smov 0  }
   0x6 LB: > { %s538_s18 = sadd.s32 4294967295, %s759_s17   ;;  %s539_s19 = sadd.s32 4294967294, %s759_s17   ;;  %s759_s17 = sphi %s795_s17, %s19_s17   ;;  %s755_s16 = sphi %s793_s16, %s960_s16   ;;  %s751_s15 = sphi %s791_s15, %s959_s15   ;;  %s747_s14 = sphi %s789_s14, %s958_s14   ;;  %s743_s13 = sphi %s787_s13, %s957_s13   ;;  %s739_s12 = sphi %s785_s12, %s956_s12  }
   0x7   : > { %s31_s20 = sadd.s32 1, %s755_s16  ;;  %s40_s21 = sadd.s32 1, %s747_s14 }
   0x8   : > { %p33_p0 = scmp.ge.s32.totalorder %s31_s20, 2  ;;  %p47_p1 = scmp.ne.s32.totalorder %s747_s14, %s743_s13 }
   0x9   : > { %p48_p2 = scmp.eq.s32.totalorder %s759_s17, 0  ;;  %p53_p3 = scmp.ne.s32.totalorder %s743_s13, %s739_s12 }
   0xa   : > { %s962_s20 = smov (%p33_p0, %s31_s20), 0  ;;  %p54_p5 = scmp.eq.s32.totalorder %s538_s18, 0 }
   0xb   : > { %p826_p4 = por %p48_p2, %p47_p1  ;;  %s35_s23 = ssub.s32 %s755_s16, %s962_s20 }
   0xc   : > { %p121_p6 = scmp.eq.s32.totalorder %s538_s18, 1  ;;  %p38_p7 = scmp.eq.s32.totalorder %s35_s23, 0 }
   0xd   : > { %p832_p8 = por %p54_p5, %p53_p3  ;;  %p127_p10 = scmp.eq.s32.totalorder %s539_s19, 1 }
   0xe   : > { %p836_p9 = por %p121_p6, %p47_p1  ;;  %p541_p12 = scmp.ge.s32.totalorder %s759_s17, 2 }
   0xf   : > { %s841_s26 = scalar_select %p38_p7, %s747_s14, %s40_s21  }
  0x10   : > { %p843_p11 = por %p127_p10, %p53_p3  ;;  %p585_p13 = scmp.lt.s32.totalorder %s759_s17, 2 }
  0x11   : > { %s153_s28 = sand.u32 1, %s747_s14   ;;  %s565_s30 = sshll.u32 %s755_s16, 6 }
  0x12   : > { %s542_s29 = sshll.u32 %s153_s28, 6  ;;  %s165_s6 = scalar_lea.hbm %s948_s0, %s565_s30 }
  0x13   : > { %s157_s7 = scalar_lea.vmem [#allocation2], %s542_s29  ;;  %s166_s9 = sshll.u32 %s165_s6, 4  ;;  %s167_s9 = int_to_ptr.hbm [resolvable:$true] %s166_s9 }
  0x14   : > { %s168_s8 = sshll.u32 %s157_s7, 4  ;;  %p578_p0 = pnand %p585_p13, %p826_p4  ;;  %s169_s8 = int_to_ptr.vmem [resolvable:$true] %s168_s8 }
  0x15   : > { %p545_p1 = scmp.ge.s32.totalorder %s759_s17, 1  ;;  %s154_s10 = scalar_lea.sflag [#allocation3], %s153_s28 }
  0x16   : > { %s761_s11 = smov 128   ;;  %s762_s18 = smov 8  }
  0x17   : > { %580 = dma.hbm_to_vmem [thread:$0]  (!%p578_p0), %s167_s9, 1024, %s169_s8, %s154_s10, %s761_s11, %s761_s11, %s762_s18  }
  0x18   : > { %p176_p2 = scmp.lt.s32.totalorder %s759_s17, 3 }
  0x1a   : > { %p177_p3 = pnand %p545_p1, %p176_p2 }
  0x1b   : > { %s859_s19 = sand.u32 (!%p177_p3), 1, %s743_s13  }
  0x1c   : > { %180 = sbr.rel (%p177_p3) target bundleno = 341 (0x155), region = 32  ;;  %s546_s21 = sshll.u32 (!%p177_p3), %s859_s19, 6 }
  0x1d   : > { %s183_s23 = scalar_lea.sflag (!%p177_p3), [#allocation3], %s859_s19  ;;  %s863_s29 = scalar_lea.vmem (!%p177_p3), [#allocation2], %s546_s21 }
  0x21   : > { %730 = dma.done.wait (%p832_p8), %s183_s23, 1024  }
  0x22   : > { %732 = vsyncadd (%p832_p8), %s183_s23, 4294966272  ;;  %v229_v0 = vld [vmem:[%s949_s1 + $0x8] sm:$0xff]  ;;  %v228_v1 = vld [vmem:[%s949_s1] sm:$0xff]  ;;  %vm230_vm0 = vcmask 130048   ;;  %s547_s6 = sshll.u32 %s859_s19, 5  ;;  %vm428_vm2 = vcmask 64512  }
  0x23   : > { %v212_v2 = vld [vmem:[%s863_s29] sm:$0xff]  ;;  %269 = vmatpush.msra.mxu0 %v229_v0  ;;  %568 = vmatpush.msra.mxu2 %v229_v0  ;;  %v218_v5 = vld [vmem:[%s863_s29 + $0x30] sm:$0xff]  ;;  %v215_v8 = vld [vmem:[%s863_s29 + $0x18] sm:$0xff]  ;;  %s899_s7 = scalar_lea.vmem [#allocation5], %s547_s6  ;;  %s566_s8 = sshll.u32 %s751_s15, 5 }
  0x24   : > { %v220_v3 = vmul.f32 %v212_v2, %v212_v2  ;;  %v216_v4 = vld [vmem:[%s863_s29 + $0x20] sm:$0xff]  ;;  %569 = vmatpush.msra.mxu3 %v229_v0  ;;  %v226_v7 = vmul.f32 %v218_v5, %v218_v5  ;;  %567 = vmatpush.msra.mxu1 %v229_v0  ;;  %v223_v9 = vmul.f32 %v215_v8, %v215_v8  ;;  %v213_v10 = vld [vmem:[%s863_s29 + $0x8] sm:$0xff]  ;;  %v219_v12 = vld [vmem:[%s863_s29 + $0x38] sm:$0xff]  ;;  %s447_s11 = scalar_lea.hbm %s951_s3, %s566_s8  ;;  %s448_s18 = sshll.u32 %s899_s7, 4  ;;  %s449_s18 = int_to_ptr.vmem [resolvable:$true] %s448_s18 }
  0x25   : > { %v224_v6 = vmul.f32 %v216_v4, %v216_v4  ;;  %270 = vmatpush.msra.mxu0 %v228_v1  ;;  %571 = vmatpush.msra.mxu2 %v228_v1  ;;  %v217_v11 = vld [vmem:[%s863_s29 + $0x28] sm:$0xff]  ;;  %v221_v13 = vmul.f32 %v213_v10, %v213_v10  ;;  %v227_v15 = vmul.f32 %v219_v12, %v219_v12  ;;  %v214_v16 = vld [vmem:[%s863_s29 + $0x10] sm:$0xff]  ;;  %v296_v23 = vld [vmem:[%s950_s2] sm:$0xff]  ;;  %s450_s21 = sshll.u32 %s447_s11, 4  ;;  %s434_s15 = scalar_lea.sflag [#allocation4], %s859_s19  ;;  %s451_s21 = int_to_ptr.hbm [resolvable:$true] %s450_s21 }
  0x26   : > { %548 = vmatmul.msk.f32.vlgmr.msra.gmra.mxu0 %vm230_vm0, %v220_v3  ;;  %572 = vmatpush.msra.mxu3 %v228_v1  ;;  %v225_v14 = vmul.f32 %v217_v11, %v217_v11  ;;  %v222_v17 = vmul.f32 %v214_v16, %v214_v16  ;;  %s691_s23 = sshra.s32 %s451_s21, 4  ;;  %s697_s30 = scalar_lea.hbm %s951_s3, 64  ;;  %s692_s23 = int_to_ptr.hbm [resolvable:$true] %s691_s23 }
  0x27   : > { %552 = vmatmul.msk.f32.vlgmr.msra.gmra.mxu2 %vm230_vm0, %v224_v6  ;;  %570 = vmatpush.msra.mxu1 %v228_v1  ;;  %s693_s29 = scalar_lea.hbm %s692_s23, 32  ;;  %p698_p7 = scmp.lt.s32.totalorder %s692_s23, %s951_s3 }
  0x28   : > { %554 = vmatmul.msk.f32.vlgmr.msra.gmra.mxu3 %vm230_vm0, %v226_v7  ;;  %551 = vmatmul.msk.f32.vlgmr.msra.gmra.mxu1 %vm230_vm0, %v223_v9  ;;  %p694_p4 = scmp.ne.s32.totalorder %s692_s23, %s693_s29  ;;  %p699_p8 = scmp.lt.s32.totalorder %s697_s30, %s693_s29 }
  0x2a   : > { %p695_p5 = pnand %p694_p4, %p836_p9  ;;  %p700_p10 = por %p699_p8, %p698_p7 }
  0x2c   : > { %p696_p6 = pneg %p695_p5 }
  0x2e   : > { %549 = vmatmul.msk.f32.gmra.mxu0 %vm230_vm0, %v221_v13  ;;  %p701_p13 = pnand %p700_p10, %p696_p6 }
  0x2f   : > { %553 = vmatmul.msk.f32.gmra.mxu2 %vm230_vm0, %v225_v14 }
  0x30   : > { %555 = vmatmul.msk.f32.gmra.mxu3 %vm230_vm0, %v227_v15 }
  0x36   : > { %550 = vmatmul.msk.f32.gmra.mxu0 %vm230_vm0, %v222_v17 }
  0xa3   : > { %v272_v18 = vpop.f32.mrf.mxu0 }
  0xa5   : > { %v281_v19 = vpop.f32.mrf.mxu1 }
  0xa6   : > { %334 = vmatpush.msrb.mxu2 %v281_v19 }
  0xaa   : > { %v284_v20 = vpop.f32.mrf.mxu2 }
  0xab   : > { %v275_v21 = vpop.f32.mrf.mxu0  ;;  %v290_v22 = vpop.f32.mrf.mxu3 }
  0xac   : > { %314 = vmatpush.msrb.mxu1 %v275_v21 }
  0xae   : > { %315 = vmatpush.msrb.mxu1 %v272_v18 }
  0xaf   : > { %556 = vmatmul.msk.f32.vlgmr.msrb.gmra.mxu1 %vm230_vm0, %v296_v23 }
  0xb2   : > { %v287_v24 = vpop.f32.mrf.mxu2 }
  0xb3   : > { %354 = vmatpush.msrb.mxu3 %v287_v24  ;;  %v278_v25 = vpop.f32.mrf.mxu0  ;;  %v293_v26 = vpop.f32.mrf.mxu3 }
  0xb4   : > { %335 = vmatpush.msrb.mxu2 %v278_v25  ;;  %374 = vmatpush.msra.mxu1 %v293_v26 }
  0xb5   : > { %355 = vmatpush.msrb.mxu3 %v284_v20  ;;  %557 = vmatmul.msk.f32.vlgmr.msrb.gmra.mxu2 %vm230_vm0, %v296_v23 }
  0xb6   : > { %558 = vmatmul.msk.f32.vlgmr.msrb.gmra.mxu3 %vm230_vm0, %v296_v23  ;;  %375 = vmatpush.msra.mxu1 %v290_v22 }
  0xb7   : > { %559 = vmatmul.msk.f32.vlgmr.msra.gmra.mxu1 %vm230_vm0, %v296_v23 }
 0x12c   : > { %v317_v27 = vpop.f32.mrf.mxu1 }
 0x12d   : > { %v318_v28 = vadd.f32 1e-12, %v317_v27 }
 0x12f   : > { %639 = vrsqrt.f32 %v318_v28  ;;  %vm387_vm1 = vcmp.eq.f32.partialorder %v318_v28, inf  ;;  %v390_v45 = vand.u32 2147483648, %v318_v28  ;;  %vm389_vm3 = vcmp.eq.f32.partialorder %v318_v28, 0.0 }
 0x134   : > { %v377_v30 = vpop.f32.mrf.mxu1 }
 0x135   : > { %v640_v29 = vpop.eup %639  ;;  %v378_v32 = vadd.f32 1e-12, %v377_v30 }
 0x136   : > { %v381_v31 = vmul.f32 %v640_v29, %v318_v28 }
 0x137   : > { %641 = vrsqrt.f32 %v378_v32  ;;  %vm423_vm4 = vcmp.eq.f32.partialorder %v378_v32, inf  ;;  %v426_v62 = vand.u32 2147483648, %v378_v32  ;;  %vm425_vm5 = vcmp.eq.f32.partialorder %v378_v32, 0.0 }
 0x138   : > { %v382_v33 = vmul.f32 %v640_v29, %v381_v31  ;;  %v337_v34 = vpop.f32.mrf.mxu2 }
 0x139   : > { %v338_v35 = vadd.f32 1e-12, %v337_v34  ;;  %v357_v36 = vpop.f32.mrf.mxu3 }
 0x13a   : > { %v383_v37 = vmul.f32 0.5, %v382_v33  ;;  %v358_v38 = vadd.f32 1e-12, %v357_v36 }
 0x13b   : > { %643 = vrsqrt.f32 %v338_v35  ;;  %vm399_vm6 = vcmp.eq.f32.partialorder %v338_v35, inf  ;;  %v402_v4 = vand.u32 2147483648, %v338_v35  ;;  %vm401_vm7 = vcmp.eq.f32.partialorder %v338_v35, 0.0 }
 0x13c   : > { %v384_v39 = vsub.f32 1.5, %v383_v37  ;;  %645 = vrsqrt.f32 %v358_v38  ;;  %vm411_vm8 = vcmp.eq.f32.partialorder %v358_v38, inf  ;;  %v414_v7 = vand.u32 2147483648, %v358_v38 }
 0x13d   : > { %v642_v40 = vpop.eup %641  ;;  %vm413_vm9 = vcmp.eq.f32.partialorder %v358_v38, 0.0 }
 0x13e   : > { %v385_v41 = vmul.f32 %v640_v29, %v384_v39  ;;  %v417_v42 = vmul.f32 %v642_v40, %v378_v32 }
 0x140   : > { %v386_v43 = vmul.f32 %v385_v41, %v318_v28  ;;  %v418_v46 = vmul.f32 %v642_v40, %v417_v42 }
 0x141   : > { %v644_v44 = vpop.eup %643 }
 0x142   : > { %v646_v47 = vpop.eup %645  ;;  %v388_v48 = vsel %vm387_vm1, %v318_v28, %v386_v43  ;;  %v393_v49 = vmul.f32 %v644_v44, %v338_v35  ;;  %v419_v51 = vmul.f32 0.5, %v418_v46 }
 0x143   : > { %v391_v50 = vsel %vm389_vm3, %v390_v45, %v388_v48  ;;  %v405_v52 = vmul.f32 %v646_v47, %v358_v38 }
 0x144   : > { %v394_v53 = vmul.f32 %v644_v44, %v393_v49  ;;  %429 = vst.msk [vmem:[%s899_s7] sm:$0xff] %vm428_vm2, %v391_v50  ;;  %v420_v54 = vsub.f32 1.5, %v419_v51 }
 0x145   : > { %v406_v55 = vmul.f32 %v646_v47, %v405_v52 }
 0x146   : > { %v395_v56 = vmul.f32 0.5, %v394_v53  ;;  %v421_v57 = vmul.f32 %v642_v40, %v420_v54 }
 0x147   : > { %v407_v58 = vmul.f32 0.5, %v406_v55 }
 0x148   : > { %v396_v59 = vsub.f32 1.5, %v395_v56  ;;  %v422_v60 = vmul.f32 %v421_v57, %v378_v32 }
 0x149   : > { %v408_v61 = vsub.f32 1.5, %v407_v58 }
 0x14a   : > { %v397_v63 = vmul.f32 %v644_v44, %v396_v59  ;;  %v424_v0 = vsel %vm423_vm4, %v378_v32, %v422_v60 }
 0x14b   : > { %v409_v1 = vmul.f32 %v646_v47, %v408_v61  ;;  %v427_v2 = vsel %vm425_vm5, %v426_v62, %v424_v0 }
 0x14c   : > { %v398_v3 = vmul.f32 %v397_v63, %v338_v35  ;;  %432 = vst.msk [vmem:[%s899_s7 + $0x18] sm:$0xff] %vm428_vm2, %v427_v2 }
 0x14d   : > { %v410_v5 = vmul.f32 %v409_v1, %v358_v38 }
 0x14e   : > { %v400_v6 = vsel %vm399_vm6, %v338_v35, %v398_v3 }
 0x14f   : > { %v403_v8 = vsel %vm401_vm7, %v402_v4, %v400_v6  ;;  %v412_v9 = vsel %vm411_vm8, %v358_v38, %v410_v5 }
 0x150   : > { %v415_v10 = vsel %vm413_vm9, %v414_v7, %v412_v9  ;;  %430 = vst.msk [vmem:[%s899_s7 + $0x8] sm:$0xff] %vm428_vm2, %v403_v8 }
 0x151   : > { %431 = vst.msk [vmem:[%s899_s7 + $0x10] sm:$0xff] %vm428_vm2, %v415_v10 }
 0x152   : > { %704 = shalt.err (!%p701_p13)
}
 0x153   : > { %s763_s19 = smov 128   ;;  %s764_s5 = smov 8  }
 0x154   : > { %575 = dma.vmem_to_hbm [thread:$0]  (%p836_p9), %s449_s18, 512, %s451_s21, %s434_s15, %s763_s19, %s763_s19, %s764_s5  }
 0x155 PF: > { %s465_s6 = sand.u32 1, %s739_s12   ;;  %p582_p0 = pnand %p541_p12, %p843_p11 }
 0x156   : > { %s466_s7 = scalar_lea.sflag [#allocation4], %s465_s6 }
 0x157   : > { %p583_p1 = pneg %p582_p0 }
 0x159   : > { %734 = dma.done.wait (%p583_p1), %s466_s7, 512  }
 0x15a   : > { %736 = vsyncadd (%p583_p1), %s466_s7, 4294966784  ;;  %s19_s17 = sadd.s32 1, %s759_s17   ;;  %s956_s12 = smov %s743_s13 }
 0x15b   : > { %p16_p2 = scmp.ge.s32.totalorder %s19_s17, 4   ;;  %s957_s13 = smov %s747_s14 }
 0x15c   : > { %s958_s14 = smov %s841_s26  ;;  %s959_s15 = smov %s755_s16 }
 0x15d   : > { %s960_s16 = smov %s962_s20  ;;  %18 = sbr.rel (!%p16_p2) target bundleno = 6 (0x6), region = 77 }
 0x162   :  { %472 = vsyncpa [#allocation3], 1 }
 0x163   :  { %474 = vsyncpa [#allocation3 + $0x1], 1 }
 0x164   :  { %475 = vsyncpa [#allocation4], 1 }
 0x165   :  { %477 = vsyncpa [#allocation4 + $0x1], 1 }

</bundles_post_ra>
